<compile_context>
chip_gen: v5e
topology: v5e:2x2
jax: 0.10.0
libtpu: 0.0.40
codegen_flags: <defaults>
</compile_context>

<pallas_src>
from functools import partial

import jax
import jax.numpy as jnp
from jax.experimental import pallas as pl
from jax.experimental.pallas import tpu as pltpu

NEG_SLOPE = 0.01    # nn.LeakyReLU() default
NUM_LAYERS = 6
NUM_MID = 4         # hidden->hidden layers (indices 1..4)
LANES = 128         # TPU vreg lane width
SUBLANES = 8        # f32 sublane count
TB_DEFAULT = 512    # batch tile (sweepable); 512x128 f32 tile = 256 KiB


def _round_up(n, m):
    return ((n + m - 1) // m) * m


def _leaky_relu(x):
    # maximum(x, a*x) == LeakyReLU(x) for slope a < 1; 2 VPU ops vs 3 for where.
    return jnp.maximum(x, NEG_SLOPE * x)


def _pick_tb(batch):
    """Batch tile: single tile for tiny batches, otherwise >= 2 tiles (so the
    'parallel' grid axis can engage both v7x TensorCores), capped at TB_DEFAULT."""
    b8 = _round_up(batch, SUBLANES)
    if b8 <= 2 * SUBLANES:
        return b8
    return min(TB_DEFAULT, _round_up(pl.cdiv(b8, 2), SUBLANES))


def qnetwork_kernel(x_ref, w0_ref, wmid_ref, wlast_ref, b_ref, o_ref):
    """x_ref: (TB, S); w0: (S, H); wmid: (4, H, H); wlast: (H, A);
    b_ref: (6, max(H, A)) f32; o_ref: (TB, A)."""
    h_pad = w0_ref.shape[1]
    a_pad = wlast_ref.shape[1]

    h = x_ref[...].astype(jnp.bfloat16)

    # Layer 0: state -> hidden.
    h = jnp.dot(h, w0_ref[...], preferred_element_type=jnp.float32)
    h = _leaky_relu(h + b_ref[0:1, :h_pad]).astype(jnp.bfloat16)

    # Layers 1..4: hidden -> hidden (fully unrolled, all MXU bf16 matmuls with
    # f32 accumulation). nn.Dropout(p=0.5) sits between layers 3 and 4 in the
    # original Sequential; eval-mode dropout == identity.
    for i in range(NUM_MID):
        h = jnp.dot(h, wmid_ref[i], preferred_element_type=jnp.float32)
        h = _leaky_relu(h + b_ref[1 + i:2 + i, :h_pad]).astype(jnp.bfloat16)

    # Layer 5: hidden -> action (no activation).
    out = jnp.dot(h, wlast_ref[...], preferred_element_type=jnp.float32)
    out = out + b_ref[NUM_LAYERS - 1:NUM_LAYERS, :a_pad]
    o_ref[...] = out.astype(o_ref.dtype)


def pack_params(params):
    """Pack [(W_i, b_i)] (W_i: (in, out)) into lane-padded slabs. Weights go to
    bf16; biases stay f32. Zero padding keeps numerics exact: padded input
    columns, padded weight rows/cols and padded biases are all zero, so padded
    activation lanes stay exactly 0 through LeakyReLU."""
    assert len(params) == NUM_LAYERS
    state_dim, hidden_dim = params[0][0].shape
    action_dim = params[-1][0].shape[1]
    s_pad = _round_up(state_dim, LANES)
    h_pad = _round_up(hidden_dim, LANES)
    a_pad = _round_up(action_dim, LANES)
    fb = max(h_pad, a_pad)

    def pad_w(w, rows, cols):
        w = jnp.asarray(w, jnp.float32).astype(jnp.bfloat16)
        return jnp.pad(w, ((0, rows - w.shape[0]), (0, cols - w.shape[1])))

    w0 = pad_w(params[0][0], s_pad, h_pad)
    wmid = jnp.stack([pad_w(params[1 + i][0], h_pad, h_pad)
                      for i in range(NUM_MID)])
    wlast = pad_w(params[-1][0], h_pad, a_pad)

    b_rows = []
    for (_, b) in params:
        b = jnp.reshape(jnp.asarray(b, jnp.float32), (-1,))
        b_rows.append(jnp.pad(b, (0, fb - b.shape[0])))
    b_slab = jnp.stack(b_rows)

    return w0, wmid, wlast, b_slab


@partial(jax.jit, static_argnames=("action_dim", "tb"))
def _qnetwork_forward(x, w0, wmid, wlast, b_slab, action_dim, tb):
    batch, state_dim = x.shape
    s_pad, h_pad = w0.shape
    a_pad = wlast.shape[1]
    fb = b_slab.shape[1]

    b_pad = _round_up(batch, tb)
    # Pad (fused under jit) instead of zeros + scatter: no extra HBM round trip.
    x_pad = jnp.pad(x.astype(jnp.float32),
                    ((0, b_pad - batch), (0, s_pad - state_dim)))

    grid = (b_pad // tb,)

    # VMEM budget: slabs (ideally single-buffered) + pipelined activation tiles.
    # Sized conservatively as if everything were double-buffered, + headroom.
    bytes_resident = (w0.size + wmid.size + wlast.size) * 2 + b_slab.size * 4
    bytes_tiles = (tb * s_pad + tb * a_pad) * 4
    vmem_limit = int(min(100 << 20,
                         max(32 << 20,
                             2 * (bytes_resident + bytes_tiles) + (8 << 20))))

    out = pl.pallas_call(
        qnetwork_kernel,
        out_shape=jax.ShapeDtypeStruct((b_pad, a_pad), jnp.float32),
        grid_spec=pltpu.PrefetchScalarGridSpec(
            num_scalar_prefetch=0,
            grid=grid,
            in_specs=[
                # Activations: tiled over the batch grid axis.
                pl.BlockSpec((tb, s_pad), lambda i: (i, 0)),
                # Constant weight/bias slabs: same block every step -> keep
                # them VMEM-resident and single-buffered (no wasted VMEM).
                pl.BlockSpec((s_pad, h_pad), lambda i: (0, 0),
                             pipeline_mode=pl.Buffered(1)),
                pl.BlockSpec((NUM_MID, h_pad, h_pad), lambda i: (0, 0, 0),
                             pipeline_mode=pl.Buffered(1)),
                pl.BlockSpec((h_pad, a_pad), lambda i: (0, 0),
                             pipeline_mode=pl.Buffered(1)),
                pl.BlockSpec((NUM_LAYERS, fb), lambda i: (0, 0),
                             pipeline_mode=pl.Buffered(1)),
            ],
            out_specs=pl.BlockSpec((tb, a_pad), lambda i: (i, 0)),
        ),
        compiler_params=pltpu.CompilerParams(
            # Batch tiles are independent -> shard across TCs on v7x megacore.
            dimension_semantics=("parallel",),
            vmem_limit_bytes=vmem_limit,
        ),
    )(x_pad, w0, wmid, wlast, b_slab)

    return out[:batch, :action_dim]


def qnetwork_forward(x, packed_params, *, action_dim, tb=None):
    """x: (B, state_dim) f32; packed_params: output of pack_params (hoisted
    out of the per-call path — pack once per parameter set)."""
    if tb is None:
        tb = _pick_tb(x.shape[0])
    w0, wmid, wlast, b_slab = packed_params
    return _qnetwork_forward(x, w0, wmid, wlast, b_slab,
                             action_dim=action_dim, tb=tb)


def init_params(key, state_dim, hidden_dim, action_dim):
    """Deterministic PyTorch-style init: U(-1/sqrt(fan_in), 1/sqrt(fan_in))."""
    dims = [(state_dim, hidden_dim),
            (hidden_dim, hidden_dim),
            (hidden_dim, hidden_dim),
            (hidden_dim, hidden_dim),
            (hidden_dim, hidden_dim),
            (hidden_dim, action_dim)]
    params = []
    for (fan_in, fan_out) in dims:
        key, kw, kb = jax.random.split(key, 3)
        bound = 1.0 / jnp.sqrt(jnp.float32(fan_in))
        w = jax.random.uniform(kw, (fan_in, fan_out), jnp.float32, -bound, bound)
        b = jax.random.uniform(kb, (1, fan_out), jnp.float32, -bound, bound)
        params.append((w, b))
    return params


def reference_forward(x, params):
    """Pure-JAX f32 reference (eval-mode dropout == identity)."""
    h = x
    for i, (w, b) in enumerate(params):
        h = h @ w + b
        if i < len(params) - 1:
            h = jnp.maximum(h, NEG_SLOPE * h)
    return h


if __name__ == "__main__":
    key = jax.random.PRNGKey(0)

    batch = 2
    state_dim = 4
    hidden_dim = 32
    action_dim = 2

    key, kx = jax.random.split(key)
    x = jax.random.normal(kx, (batch, state_dim), jnp.float32)

    params = init_params(key, state_dim, hidden_dim, action_dim)
    packed = pack_params(params)   # packed once, reused across calls

    out = qnetwork_forward(x, packed, action_dim=action_dim)
    out = jax.block_until_ready(out)

    ref = reference_forward(x, params)
    assert out.shape == (batch, action_dim)
    # bf16 weights/activations with f32 accumulation vs f32 reference.
    assert jnp.allclose(out, ref, atol=5e-2, rtol=5e-2), "mismatch vs reference"

    # Multi-tile path: 300 rows -> two batch tiles (exercises the parallel
    # grid axis / megacore sharding and the pipelined activation DMAs).
    key, kx2 = jax.random.split(key)
    x_big = jax.random.normal(kx2, (300, state_dim), jnp.float32)
    out_big = jax.block_until_ready(
        qnetwork_forward(x_big, packed, action_dim=action_dim))
    ref_big = reference_forward(x_big, params)
    assert out_big.shape == (300, action_dim)
    assert jnp.allclose(out_big, ref_big, atol=5e-2, rtol=5e-2), "batched mismatch"

    print("KERNEL_OK")
</pallas_src>

<mosaic_0001>
module attributes {stable_mosaic.version = 11 : i64} {
  func.func @qnetwork_kernel(%arg0: i32, %arg1: memref<8x128xf32, #tpu.memory_space<vmem>>, %arg2: memref<128x128xbf16, #tpu.memory_space<vmem>>, %arg3: memref<4x128x128xbf16, #tpu.memory_space<vmem>>, %arg4: memref<128x128xbf16, #tpu.memory_space<vmem>>, %arg5: memref<6x128xf32, #tpu.memory_space<vmem>>, %arg6: memref<8x128xf32, #tpu.memory_space<vmem>>) attributes {dimension_semantics = [#tpu.dimension_semantics<parallel>], iteration_bounds = array<i64: 1>, scalar_prefetch = 0 : i64, scratch_operands = 0 : i64, tpu.core_type = #tpu.core_type<tc>, window_params = [{transform_indices = @transform_0, window_bounds = array<i64: 8, 128>}, {pipeline_mode = #tpu.pipeline_mode<synchronous>, transform_indices = @transform_1, window_bounds = array<i64: 128, 128>}, {pipeline_mode = #tpu.pipeline_mode<synchronous>, transform_indices = @transform_2, window_bounds = array<i64: 4, 128, 128>}, {pipeline_mode = #tpu.pipeline_mode<synchronous>, transform_indices = @transform_3, window_bounds = array<i64: 128, 128>}, {pipeline_mode = #tpu.pipeline_mode<synchronous>, transform_indices = @transform_4, window_bounds = array<i64: 6, 128>}, {transform_indices = @transform_5, window_bounds = array<i64: 8, 128>}]} {
    %c0 = arith.constant 0 : index
    %c0_0 = arith.constant 0 : index
    %0 = vector.load %arg1[%c0, %c0_0] : memref<8x128xf32, #tpu.memory_space<vmem>>, vector<8x128xf32>
    %1 = arith.truncf %0 : vector<8x128xf32> to vector<8x128xbf16>
    %c0_1 = arith.constant 0 : index
    %c0_2 = arith.constant 0 : index
    %2 = vector.load %arg2[%c0_1, %c0_2] : memref<128x128xbf16, #tpu.memory_space<vmem>>, vector<128x128xbf16>
    %cst = arith.constant dense<0.000000e+00> : vector<8x128xf32>
    %3 = tpu.matmul %1, %2, %cst {dimension_numbers = #tpu.dot_dimension_numbers<[1], [0], [0], [1], [0, 0, 1, 1], [], []>} : vector<8x128xbf16>, vector<128x128xbf16>, vector<8x128xf32> -> vector<8x128xf32>
    %c0_3 = arith.constant 0 : index
    %c0_4 = arith.constant 0 : index
    %4 = vector.load %arg5[%c0_3, %c0_4] : memref<6x128xf32, #tpu.memory_space<vmem>>, vector<1x128xf32>
    %5 = vector.broadcast %4 : vector<1x128xf32> to vector<8x128xf32>
    %6 = arith.addf %3, %5 : vector<8x128xf32>
    %cst_5 = arith.constant 0.00999999977 : f32
    %7 = vector.broadcast %cst_5 : f32 to vector<8x128xf32>
    %8 = arith.mulf %7, %6 : vector<8x128xf32>
    %9 = arith.maximumf %6, %8 : vector<8x128xf32>
    %10 = arith.truncf %9 : vector<8x128xf32> to vector<8x128xbf16>
    %c0_6 = arith.constant 0 : index
    %c0_7 = arith.constant 0 : index
    %c0_8 = arith.constant 0 : index
    %11 = vector.load %arg3[%c0_6, %c0_7, %c0_8] : memref<4x128x128xbf16, #tpu.memory_space<vmem>>, vector<1x128x128xbf16>
    %12 = vector.shape_cast %11 : vector<1x128x128xbf16> to vector<128x128xbf16>
    %cst_9 = arith.constant dense<0.000000e+00> : vector<8x128xf32>
    %13 = tpu.matmul %10, %12, %cst_9 {dimension_numbers = #tpu.dot_dimension_numbers<[1], [0], [0], [1], [0, 0, 1, 1], [], []>} : vector<8x128xbf16>, vector<128x128xbf16>, vector<8x128xf32> -> vector<8x128xf32>
    %c1 = arith.constant 1 : index
    %c0_10 = arith.constant 0 : index
    %14 = vector.load %arg5[%c1, %c0_10] : memref<6x128xf32, #tpu.memory_space<vmem>>, vector<1x128xf32>
    %15 = vector.broadcast %14 : vector<1x128xf32> to vector<8x128xf32>
    %16 = arith.addf %13, %15 : vector<8x128xf32>
    %cst_11 = arith.constant 0.00999999977 : f32
    %17 = vector.broadcast %cst_11 : f32 to vector<8x128xf32>
    %18 = arith.mulf %17, %16 : vector<8x128xf32>
    %19 = arith.maximumf %16, %18 : vector<8x128xf32>
    %20 = arith.truncf %19 : vector<8x128xf32> to vector<8x128xbf16>
    %c1_12 = arith.constant 1 : index
    %c0_13 = arith.constant 0 : index
    %c0_14 = arith.constant 0 : index
    %21 = vector.load %arg3[%c1_12, %c0_13, %c0_14] : memref<4x128x128xbf16, #tpu.memory_space<vmem>>, vector<1x128x128xbf16>
    %22 = vector.shape_cast %21 : vector<1x128x128xbf16> to vector<128x128xbf16>
    %cst_15 = arith.constant dense<0.000000e+00> : vector<8x128xf32>
    %23 = tpu.matmul %20, %22, %cst_15 {dimension_numbers = #tpu.dot_dimension_numbers<[1], [0], [0], [1], [0, 0, 1, 1], [], []>} : vector<8x128xbf16>, vector<128x128xbf16>, vector<8x128xf32> -> vector<8x128xf32>
    %c2 = arith.constant 2 : index
    %c0_16 = arith.constant 0 : index
    %24 = vector.load %arg5[%c2, %c0_16] : memref<6x128xf32, #tpu.memory_space<vmem>>, vector<1x128xf32>
    %25 = vector.broadcast %24 : vector<1x128xf32> to vector<8x128xf32>
    %26 = arith.addf %23, %25 : vector<8x128xf32>
    %cst_17 = arith.constant 0.00999999977 : f32
    %27 = vector.broadcast %cst_17 : f32 to vector<8x128xf32>
    %28 = arith.mulf %27, %26 : vector<8x128xf32>
    %29 = arith.maximumf %26, %28 : vector<8x128xf32>
    %30 = arith.truncf %29 : vector<8x128xf32> to vector<8x128xbf16>
    %c2_18 = arith.constant 2 : index
    %c0_19 = arith.constant 0 : index
    %c0_20 = arith.constant 0 : index
    %31 = vector.load %arg3[%c2_18, %c0_19, %c0_20] : memref<4x128x128xbf16, #tpu.memory_space<vmem>>, vector<1x128x128xbf16>
    %32 = vector.shape_cast %31 : vector<1x128x128xbf16> to vector<128x128xbf16>
    %cst_21 = arith.constant dense<0.000000e+00> : vector<8x128xf32>
    %33 = tpu.matmul %30, %32, %cst_21 {dimension_numbers = #tpu.dot_dimension_numbers<[1], [0], [0], [1], [0, 0, 1, 1], [], []>} : vector<8x128xbf16>, vector<128x128xbf16>, vector<8x128xf32> -> vector<8x128xf32>
    %c3 = arith.constant 3 : index
    %c0_22 = arith.constant 0 : index
    %34 = vector.load %arg5[%c3, %c0_22] : memref<6x128xf32, #tpu.memory_space<vmem>>, vector<1x128xf32>
    %35 = vector.broadcast %34 : vector<1x128xf32> to vector<8x128xf32>
    %36 = arith.addf %33, %35 : vector<8x128xf32>
    %cst_23 = arith.constant 0.00999999977 : f32
    %37 = vector.broadcast %cst_23 : f32 to vector<8x128xf32>
    %38 = arith.mulf %37, %36 : vector<8x128xf32>
    %39 = arith.maximumf %36, %38 : vector<8x128xf32>
    %40 = arith.truncf %39 : vector<8x128xf32> to vector<8x128xbf16>
    %c3_24 = arith.constant 3 : index
    %c0_25 = arith.constant 0 : index
    %c0_26 = arith.constant 0 : index
    %41 = vector.load %arg3[%c3_24, %c0_25, %c0_26] : memref<4x128x128xbf16, #tpu.memory_space<vmem>>, vector<1x128x128xbf16>
    %42 = vector.shape_cast %41 : vector<1x128x128xbf16> to vector<128x128xbf16>
    %cst_27 = arith.constant dense<0.000000e+00> : vector<8x128xf32>
    %43 = tpu.matmul %40, %42, %cst_27 {dimension_numbers = #tpu.dot_dimension_numbers<[1], [0], [0], [1], [0, 0, 1, 1], [], []>} : vector<8x128xbf16>, vector<128x128xbf16>, vector<8x128xf32> -> vector<8x128xf32>
    %c4 = arith.constant 4 : index
    %c0_28 = arith.constant 0 : index
    %44 = vector.load %arg5[%c4, %c0_28] : memref<6x128xf32, #tpu.memory_space<vmem>>, vector<1x128xf32>
    %45 = vector.broadcast %44 : vector<1x128xf32> to vector<8x128xf32>
    %46 = arith.addf %43, %45 : vector<8x128xf32>
    %cst_29 = arith.constant 0.00999999977 : f32
    %47 = vector.broadcast %cst_29 : f32 to vector<8x128xf32>
    %48 = arith.mulf %47, %46 : vector<8x128xf32>
    %49 = arith.maximumf %46, %48 : vector<8x128xf32>
    %50 = arith.truncf %49 : vector<8x128xf32> to vector<8x128xbf16>
    %c0_30 = arith.constant 0 : index
    %c0_31 = arith.constant 0 : index
    %51 = vector.load %arg4[%c0_30, %c0_31] : memref<128x128xbf16, #tpu.memory_space<vmem>>, vector<128x128xbf16>
    %cst_32 = arith.constant dense<0.000000e+00> : vector<8x128xf32>
    %52 = tpu.matmul %50, %51, %cst_32 {dimension_numbers = #tpu.dot_dimension_numbers<[1], [0], [0], [1], [0, 0, 1, 1], [], []>} : vector<8x128xbf16>, vector<128x128xbf16>, vector<8x128xf32> -> vector<8x128xf32>
    %c5 = arith.constant 5 : index
    %c0_33 = arith.constant 0 : index
    %53 = vector.load %arg5[%c5, %c0_33] : memref<6x128xf32, #tpu.memory_space<vmem>>, vector<1x128xf32>
    %54 = vector.broadcast %53 : vector<1x128xf32> to vector<8x128xf32>
    %55 = arith.addf %52, %54 : vector<8x128xf32>
    %c0_34 = arith.constant 0 : index
    %c0_35 = arith.constant 0 : index
    %56 = vector.load %arg6[%c0_34, %c0_35] : memref<8x128xf32, #tpu.memory_space<vmem>>, vector<8x128xf32>
    tpu.vector_store %arg6[%c0_34, %c0_35], %55 {strides = array<i32>} : memref<8x128xf32, #tpu.memory_space<vmem>>, vector<8x128xf32>,
    return
  }
  func.func @transform_0(%arg0: i32) -> (i32, i32) {
    %c0_i32 = arith.constant 0 : i32
    %c0_i32_0 = arith.constant 0 : i32
    return %arg0, %c0_i32 : i32, i32
  }
  func.func @transform_1(%arg0: i32) -> (i32, i32) {
    %c0_i32 = arith.constant 0 : i32
    %c0_i32_0 = arith.constant 0 : i32
    %c0_i32_1 = arith.constant 0 : i32
    return %c0_i32, %c0_i32_0 : i32, i32
  }
  func.func @transform_2(%arg0: i32) -> (i32, i32, i32) {
    %c0_i32 = arith.constant 0 : i32
    %c0_i32_0 = arith.constant 0 : i32
    %c0_i32_1 = arith.constant 0 : i32
    %c0_i32_2 = arith.constant 0 : i32
    return %c0_i32, %c0_i32_0, %c0_i32_1 : i32, i32, i32
  }
  func.func @transform_3(%arg0: i32) -> (i32, i32) {
    %c0_i32 = arith.constant 0 : i32
    %c0_i32_0 = arith.constant 0 : i32
    %c0_i32_1 = arith.constant 0 : i32
    return %c0_i32, %c0_i32_0 : i32, i32
  }
  func.func @transform_4(%arg0: i32) -> (i32, i32) {
    %c0_i32 = arith.constant 0 : i32
    %c0_i32_0 = arith.constant 0 : i32
    %c0_i32_1 = arith.constant 0 : i32
    return %c0_i32, %c0_i32_0 : i32, i32
  }
  func.func @transform_5(%arg0: i32) -> (i32, i32) {
    %c0_i32 = arith.constant 0 : i32
    %c0_i32_0 = arith.constant 0 : i32
    return %arg0, %c0_i32 : i32, i32
  }
}

</mosaic_0001>

<bundles_post_ra>
// kernel: _qnetwork_forward.1
= control target key start
LH: loop header
LB: loop body
LE: loop exit
PB: predicated region body
PF: predicated region fallthrough
CT: control target
= control target key end

     0   :  { %10 = vsyncpa [#allocation3], 0  ;;  %s963_s0 = inlined_call_operand.vmem [shape: f32[8,128], index: 0, kind: input, shape index: {}]   ;;  %s964_s1 = inlined_call_operand.hbm [shape: bf16[128,128], index: 1, kind: input, shape index: {}]   ;;  %s965_s2 = inlined_call_operand.hbm [shape: bf16[4,128,128], index: 2, kind: input, shape index: {}]   ;;  %s966_s3 = inlined_call_operand.hbm [shape: bf16[128,128], index: 3, kind: input, shape index: {}]   ;;  %s967_s4 = inlined_call_operand.vmem [shape: f32[6,128], index: 4, kind: input, shape index: {}]   ;;  %s968_s5 = inlined_call_operand.vmem [shape: f32[8,128], index: 5, kind: output, shape index: {}]  }
   0x1   :  { %11 = vsyncpa [#allocation5], 0  ;;  %s31_s20 = sshll.u32 %s965_s2, 4  ;;  %s895_s21 = smov [#allocation4]   ;;  %s32_s20 = int_to_ptr.hbm [resolvable:$true] %s31_s20 }
   0x2   :  { %s33_s22 = sshll.u32 %s895_s21, 4  ;;  %s18_s25 = sshll.u32 %s964_s1, 4  ;;  %s34_s22 = int_to_ptr.vmem [resolvable:$true] %s33_s22  ;;  %s19_s25 = int_to_ptr.hbm [resolvable:$true] %s18_s25 }
   0x3   :  { %s896_s26 = smov 64   ;;  %s897_s27 = smov 4  }
   0x4   :  { %39 = dma.hbm_to_vmem [thread:$0]  %s32_s20, 4096, %s34_s22, [#allocation5], %s896_s26, %s896_s26, %s897_s27  }
   0x5   :  { %s898_s28 = smov [#allocation2]   ;;  %s44_s7 = sshll.u32 %s966_s3, 4  ;;  %s45_s7 = int_to_ptr.hbm [resolvable:$true] %s44_s7 }
   0x6   :  { %s20_s29 = sshll.u32 %s898_s28, 4  ;;  %s899_s2 = smov [#allocation6]   ;;  %s21_s29 = int_to_ptr.vmem [resolvable:$true] %s20_s29 }
   0x7   :  { %26 = dma.hbm_to_vmem [thread:$0]  %s19_s25, 1024, %s21_s29, [#allocation3], %s896_s26, %s896_s26, %s897_s27  }
   0x8   :  { %s46_s8 = sshll.u32 %s899_s2, 4  ;;  %s47_s8 = int_to_ptr.vmem [resolvable:$true] %s46_s8 }
   0x9   :  { %52 = dma.hbm_to_vmem [thread:$0]  %s45_s7, 1024, %s47_s8, [#allocation5], %s896_s26, %s896_s26, %s897_s27  }
   0xa   :  { %891 = dma.done.wait [#allocation3], 1024  }
   0xb   :  { %892 = vsyncadd [#allocation3], 4294966272 }
   0xc   :  { %893 = dma.done.wait [#allocation5], 5120  }
   0xd   :  { %894 = vsyncadd [#allocation5], 4294962176  ;;  %v767_v0 = vld [vmem:[#allocation2 + $0x38] sm:$0xff]  ;;  %v766_v1 = vld [vmem:[#allocation2 + $0x30] sm:$0xff] }
   0xe   :  { %135 = vmatpush.bf16.msra.mxu0 %v767_v0  ;;  %v775_v2 = vld [vmem:[#allocation4 + $0x38] sm:$0xff]  ;;  %v765_v3 = vld [vmem:[#allocation2 + $0x28] sm:$0xff]  ;;  %v774_v4 = vld [vmem:[#allocation4 + $0x30] sm:$0xff] }
   0xf   :  { %217 = vmatpush.bf16.msra.mxu1 %v775_v2  ;;  %v773_v5 = vld [vmem:[#allocation4 + $0x28] sm:$0xff]  ;;  %v764_v6 = vld [vmem:[#allocation2 + $0x20] sm:$0xff]  ;;  %v763_v8 = vld [vmem:[#allocation2 + $0x18] sm:$0xff] }
  0x10   :  { %v772_v7 = vld [vmem:[#allocation4 + $0x20] sm:$0xff]  ;;  %v771_v9 = vld [vmem:[#allocation4 + $0x18] sm:$0xff]  ;;  %v762_v10 = vld [vmem:[#allocation2 + $0x10] sm:$0xff] }
  0x11   :  { %v770_v11 = vld [vmem:[#allocation4 + $0x10] sm:$0xff]  ;;  %v761_v12 = vld [vmem:[#allocation2 + $0x8] sm:$0xff]  ;;  %v760_v13 = vld [vmem:[#allocation2] sm:$0xff] }
  0x12   :  { %136 = vmatpush.bf16.msra.mxu0 %v766_v1  ;;  %v67_v14 = vld [vmem:[%s963_s0] sm:$0xff]  ;;  %v769_v16 = vld [vmem:[#allocation4 + $0x8] sm:$0xff]  ;;  %v783_v18 = vld [vmem:[#allocation4 + $0x78] sm:$0xff] }
  0x13   :  { %218 = vmatpush.bf16.msra.mxu1 %v774_v4  ;;  %v68_v15 = vpack.c.bf16 %v67_v14, %v67_v14  ;;  %v768_v17 = vld [vmem:[#allocation4] sm:$0xff]  ;;  %300 = vmatpush.bf16.msra.mxu2 %v783_v18  ;;  %v782_v19 = vld [vmem:[#allocation4 + $0x70] sm:$0xff]  ;;  %v781_v20 = vld [vmem:[#allocation4 + $0x68] sm:$0xff] }
  0x14   :  { %v780_v21 = vld [vmem:[#allocation4 + $0x60] sm:$0xff]  ;;  %v779_v22 = vld [vmem:[#allocation4 + $0x58] sm:$0xff]  ;;  %v778_v23 = vld [vmem:[#allocation4 + $0x50] sm:$0xff] }
  0x15   :  { %v813_v24 = vld [vmem:[%s967_s4] ss:$0 sm:$0xff]  ;;  %v777_v31 = vld [vmem:[#allocation4 + $0x48] sm:$0xff]  ;;  %v791_v33 = vld [vmem:[#allocation4 + $0xb8] sm:$0xff] }
  0x16   :  { %137 = vmatpush.bf16.msra.mxu0 %v765_v3  ;;  %v776_v32 = vld [vmem:[#allocation4 + $0x40] sm:$0xff]  ;;  %383 = vmatpush.bf16.msra.mxu3 %v791_v33  ;;  %v790_v34 = vld [vmem:[#allocation4 + $0xb0] sm:$0xff]  ;;  %v789_v35 = vld [vmem:[#allocation4 + $0xa8] sm:$0xff] }
  0x17   :  { %219 = vmatpush.bf16.msra.mxu1 %v773_v5  ;;  %301 = vmatpush.bf16.msra.mxu2 %v782_v19  ;;  %v788_v36 = vld [vmem:[#allocation4 + $0xa0] sm:$0xff]  ;;  %v787_v37 = vld [vmem:[#allocation4 + $0x98] sm:$0xff]  ;;  %v786_v38 = vld [vmem:[#allocation4 + $0x90] sm:$0xff] }
  0x18   :  { %v814_v39 = vld [vmem:[%s967_s4 + $0x1] ss:$0 sm:$0xff]  ;;  %v785_v46 = vld [vmem:[#allocation4 + $0x88] sm:$0xff]  ;;  %v799_v48 = vld [vmem:[#allocation4 + $0xf8] sm:$0xff] }
  0x19   :  { %v784_v47 = vld [vmem:[#allocation4 + $0x80] sm:$0xff]  ;;  %v798_v49 = vld [vmem:[#allocation4 + $0xf0] sm:$0xff]  ;;  %v797_v50 = vld [vmem:[#allocation4 + $0xe8] sm:$0xff] }
  0x1a   :  { %138 = vmatpush.bf16.msra.mxu0 %v764_v6  ;;  %384 = vmatpush.bf16.msra.mxu3 %v790_v34  ;;  %v796_v51 = vld [vmem:[#allocation4 + $0xe0] sm:$0xff]  ;;  %v795_v52 = vld [vmem:[#allocation4 + $0xd8] sm:$0xff]  ;;  %v794_v53 = vld [vmem:[#allocation4 + $0xd0] sm:$0xff] }
  0x1b   :  { %220 = vmatpush.bf16.msra.mxu1 %v772_v7  ;;  %302 = vmatpush.bf16.msra.mxu2 %v781_v20  ;;  %v815_v54 = vld [vmem:[%s967_s4 + $0x2] ss:$0 sm:$0xff]  ;;  %v793_v61 = vld [vmem:[#allocation4 + $0xc8] sm:$0xff]  ;;  %v807_v63 = vld [vmem:[#allocation6 + $0x38] sm:$0xff] }
  0x1c   :  { %v792_v62 = vld [vmem:[#allocation4 + $0xc0] sm:$0xff]  ;;  %v806_v0 = vld [vmem:[#allocation6 + $0x30] sm:$0xff]  ;;  %v805_v1 = vld [vmem:[#allocation6 + $0x28] sm:$0xff] }
  0x1d   :  { %v804_v2 = vld [vmem:[#allocation6 + $0x20] sm:$0xff]  ;;  %v803_v3 = vld [vmem:[#allocation6 + $0x18] sm:$0xff]  ;;  %v802_v4 = vld [vmem:[#allocation6 + $0x10] sm:$0xff] }
  0x1e   :  { %139 = vmatpush.bf16.msra.mxu0 %v763_v8  ;;  %385 = vmatpush.bf16.msra.mxu3 %v789_v35  ;;  %v816_v5 = vld [vmem:[%s967_s4 + $0x3] ss:$0 sm:$0xff]  ;;  %v817_v14 = vld [vmem:[%s967_s4 + $0x4] ss:$0 sm:$0xff] }
  0x1f   :  { %221 = vmatpush.bf16.msra.mxu1 %v771_v9  ;;  %303 = vmatpush.bf16.msra.mxu2 %v780_v21  ;;  %v818_v21 = vld [vmem:[%s967_s4 + $0x5] ss:$0 sm:$0xff] }
  0x22   :  { %140 = vmatpush.bf16.msra.mxu0 %v762_v10  ;;  %386 = vmatpush.bf16.msra.mxu3 %v788_v36 }
  0x23   :  { %222 = vmatpush.bf16.msra.mxu1 %v770_v11  ;;  %304 = vmatpush.bf16.msra.mxu2 %v779_v22 }
  0x26   :  { %141 = vmatpush.bf16.msra.mxu0 %v761_v12  ;;  %387 = vmatpush.bf16.msra.mxu3 %v787_v37  ;;  %v801_v12 = vld [vmem:[#allocation6 + $0x8] sm:$0xff] }
  0x27   :  { %223 = vmatpush.bf16.msra.mxu1 %v769_v16  ;;  %305 = vmatpush.bf16.msra.mxu2 %v778_v23 }
  0x2a   :  { %142 = vmatpush.bf16.msra.mxu0 %v760_v13  ;;  %388 = vmatpush.bf16.msra.mxu3 %v786_v38  ;;  %v800_v13 = vld [vmem:[#allocation6] sm:$0xff] }
  0x2b   :  { %224 = vmatpush.bf16.msra.mxu1 %v768_v17  ;;  %306 = vmatpush.bf16.msra.mxu2 %v777_v31 }
  0x2d   :  { %143 = vmatmul.bf16.vlgmr.msra.gmra.mxu0 %v68_v15 }
  0x2e   :  { %389 = vmatpush.bf16.msra.mxu3 %v785_v46  ;;  %466 = vmatpush.bf16.msrb.mxu0 %v799_v48 }
  0x2f   :  { %307 = vmatpush.bf16.msra.mxu2 %v776_v32  ;;  %548 = vmatpush.bf16.msrb.mxu1 %v807_v63 }
  0x32   :  { %390 = vmatpush.bf16.msra.mxu3 %v784_v47  ;;  %467 = vmatpush.bf16.msrb.mxu0 %v798_v49 }
  0x33   :  { %549 = vmatpush.bf16.msrb.mxu1 %v806_v0 }
  0x36   :  { %468 = vmatpush.bf16.msrb.mxu0 %v797_v50 }
  0x37   :  { %550 = vmatpush.bf16.msrb.mxu1 %v805_v1 }
  0x3a   :  { %469 = vmatpush.bf16.msrb.mxu0 %v796_v51 }
  0x3b   :  { %551 = vmatpush.bf16.msrb.mxu1 %v804_v2 }
  0x3e   :  { %470 = vmatpush.bf16.msrb.mxu0 %v795_v52 }
  0x3f   :  { %552 = vmatpush.bf16.msrb.mxu1 %v803_v3 }
  0x42   :  { %471 = vmatpush.bf16.msrb.mxu0 %v794_v53 }
  0x43   :  { %553 = vmatpush.bf16.msrb.mxu1 %v802_v4 }
  0x46   :  { %472 = vmatpush.bf16.msrb.mxu0 %v793_v61 }
  0x47   :  { %554 = vmatpush.bf16.msrb.mxu1 %v801_v12 }
  0x4a   :  { %473 = vmatpush.bf16.msrb.mxu0 %v792_v62 }
  0x4b   :  { %555 = vmatpush.bf16.msrb.mxu1 %v800_v13 }
  0xaa   :  { %v144_v25 = vpop.f32.mrf.mxu0 }
  0xab   :  { %v145_v26 = vadd.f32 %v813_v24, %v144_v25 }
  0xad   :  { %v148_v27 = vmul.f32 0.01, %v145_v26 }
  0xaf   :  { %v149_v28 = vmax.f32 %v145_v26, %v148_v27 }
  0xb1   :  { %v150_v29 = vpack.c.bf16 %v149_v28, %v149_v28 }
  0xb2   :  { %v146_v30 = vpop.f32.mrf.mxu0 }
  0xb3   :  { %225 = vmatmul.bf16.vlgmr.msra.gmra.mxu1 %v150_v29 }
 0x130   :  { %v226_v40 = vpop.f32.mrf.mxu1 }
 0x131   :  { %v227_v41 = vadd.f32 %v814_v39, %v226_v40 }
 0x133   :  { %v230_v42 = vmul.f32 0.01, %v227_v41 }
 0x135   :  { %v231_v43 = vmax.f32 %v227_v41, %v230_v42 }
 0x137   :  { %v232_v44 = vpack.c.bf16 %v231_v43, %v231_v43 }
 0x138   :  { %v228_v45 = vpop.f32.mrf.mxu1 }
 0x139   :  { %308 = vmatmul.bf16.vlgmr.msra.gmra.mxu2 %v232_v44 }
 0x1bc   :  { %v309_v55 = vpop.f32.mrf.mxu2 }
 0x1bd   :  { %v310_v56 = vadd.f32 %v815_v54, %v309_v55 }
 0x1bf   :  { %v313_v57 = vmul.f32 0.01, %v310_v56 }
 0x1c1   :  { %v314_v58 = vmax.f32 %v310_v56, %v313_v57 }
 0x1c3   :  { %v315_v59 = vpack.c.bf16 %v314_v58, %v314_v58 }
 0x1c4   :  { %v311_v60 = vpop.f32.mrf.mxu2 }
 0x1c5   :  { %391 = vmatmul.bf16.vlgmr.msra.gmra.mxu3 %v315_v59 }
 0x248   :  { %v392_v6 = vpop.f32.mrf.mxu3 }
 0x249   :  { %v393_v7 = vadd.f32 %v816_v5, %v392_v6 }
 0x24b   :  { %v396_v8 = vmul.f32 0.01, %v393_v7 }
 0x24d   :  { %v397_v9 = vmax.f32 %v393_v7, %v396_v8 }
 0x24f   :  { %v398_v10 = vpack.c.bf16 %v397_v9, %v397_v9 }
 0x250   :  { %v394_v11 = vpop.f32.mrf.mxu3 }
 0x251   :  { %474 = vmatmul.bf16.vlgmr.msrb.gmra.mxu0 %v398_v10 }
 0x2ce   :  { %v475_v15 = vpop.f32.mrf.mxu0 }
 0x2cf   :  { %v476_v16 = vadd.f32 %v817_v14, %v475_v15 }
 0x2d1   :  { %v479_v17 = vmul.f32 0.01, %v476_v16 }
 0x2d3   :  { %v480_v18 = vmax.f32 %v476_v16, %v479_v17 }
 0x2d5   :  { %v481_v19 = vpack.c.bf16 %v480_v18, %v480_v18 }
 0x2d6   :  { %v477_v20 = vpop.f32.mrf.mxu0 }
 0x2d7   :  { %556 = vmatmul.bf16.vlgmr.msrb.gmra.mxu1 %v481_v19 }
 0x354   :  { %v557_v22 = vpop.f32.mrf.mxu1 }
 0x355   :  { %v558_v23 = vadd.f32 %v818_v21, %v557_v22 }
 0x357   :  { %561 = vst [vmem:[%s968_s5] sm:$0xff] %v558_v23 }
 0x35c   :  { %v559_v24 = vpop.f32.mrf.mxu1 }
 0x35d   :  { %566 = vsyncpa [#allocation3], 1 }
 0x35e   :  { %567 = vsyncpa [#allocation5], 1 }

</bundles_post_ra>
